<compile_context>
chip_gen: v7x
topology: tpu7x:2x2x1
jax: 0.10.0
libtpu: 0.0.40
codegen_flags: <defaults>
</compile_context>

<pallas_src>
import functools

import jax
import jax.numpy as jnp
from jax.experimental import pallas as pl
from jax.experimental.pallas import tpu as pltpu


def _round_up(n: int, m: int) -> int:
    return ((n + m - 1) // m) * m


def _kan_spline_kernel(xT_ref, wt_ref, shift_ref, shift0_ref, sel_ref, o_ref, *,
                       inv_tau, m_channels):
    # xT_ref:     [D, TB]     lane-dense batch tile (batch on the 128-lane axis)
    # wt_ref:     [MK, D]     row j = W[:, j // K]  (channel weights repeated K times)
    # shift_ref:  [MK, 1]     b[j//K] - knots[j//K, j%K]
    # shift0_ref: [MK, 1]     b[j//K] - knots[j//K, 0]   (per-channel softmax anchor)
    # sel_ref:    [2M, MK]    rows 0..M-1: 0/1 segment selector (denominator)
    #                          rows M..2M-1: coef-weighted selector (numerator)
    # o_ref:      [1, TB]     lane-dense output row
    xT = xT_ref[...].astype(jnp.float32)                                   # [D, TB]

    # Projection with batch on lanes: u[j, b] = sum_d W_rep[j, d] * x[b, d].
    u = jnp.dot(wt_ref[...], xT, preferred_element_type=jnp.float32)       # [MK, TB]

    # Stabilized softmax numerator terms, anchor = k=0 logit of each channel:
    #   e_jk = exp((|u + shift0| - |u + shift_k|) / tau)   (anchor folded, one mul)
    e = jnp.exp((jnp.abs(u + shift0_ref[...]) - jnp.abs(u + shift_ref[...]))
                * inv_tau)                                                  # [MK, TB]

    # Fused segmented K-sums on the MXU: one [2M,MK]@[MK,TB] pass.
    sums = jnp.dot(sel_ref[...], e, preferred_element_type=jnp.float32)     # [2M, TB]
    den = sums[:m_channels, :]                                              # [M, TB]
    num = sums[m_channels:, :]                                              # [M, TB]

    # Deferred divide on the small [M, TB] result, then channel sum -> [1, TB] row.
    v = num / den                                                           # [M, TB]
    o_ref[...] = jnp.sum(v, axis=0, keepdims=True)


def kan_spline_predicate(x, w, b, knots, coefs, *, tau=0.05, block_b=None):
    """x: [B, in_dim], w: [in_dim, m], b: [m], knots/coefs: [m, K] -> [B] (float32)."""
    B, D = x.shape
    M = w.shape[1]
    K = knots.shape[1]
    MK = M * K
    f32 = jnp.float32

    # Batch tile: large (2048) to amortize the ~0.35 us/step pipeline overhead; cap is
    # safe on every generation's scoped-VMEM budget.  When block_b is not forced, keep
    # grid_b >= 2 for batches that allow it (v7x 2-TC "parallel" sharding).
    if block_b is None:
        block_b = min(2048, _round_up(max(B, 1), 128))
        if B > 2 * 128 and _round_up(B, block_b) // block_b < 2:
            block_b = _round_up((B + 1) // 2, 128)
    block_b = max(128, _round_up(block_b, 128))
    B_pad = _round_up(B, block_b)
    grid_b = B_pad // block_b

    # Lane-dense x: [D, B_pad] so the batch sits on the 128-lane axis everywhere.
    x_t = x.astype(f32).T                                                    # [D, B]
    if B_pad != B:
        x_t = jnp.pad(x_t, ((0, 0), (0, B_pad - B)))   # masked tail via padding

    # --- tiny parameter pre-expansion (done once per call, outside the kernel) ---
    w_rep_t = jnp.repeat(w.T.astype(f32), K, axis=0)                        # [MK, D]
    b_rep = jnp.repeat(b.astype(f32), K)                                    # [MK]
    shift_t = (b_rep - knots.astype(f32).reshape(-1))[:, None]              # [MK, 1]
    shift0_t = (b_rep - jnp.repeat(knots.astype(f32)[:, 0], K))[:, None]    # [MK, 1]
    coefs_flat = coefs.astype(f32).reshape(-1)                              # [MK]
    sden = jnp.repeat(jnp.eye(M, dtype=f32), K, axis=1)                     # [M, MK]
    sel = jnp.concatenate([sden, sden * coefs_flat[None, :]], axis=0)       # [2M, MK]

    cost = pl.CostEstimate(
        flops=2 * (MK * D + 2 * M * MK) * B_pad,
        transcendentals=MK * B_pad,
        bytes_accessed=(B_pad * D + B_pad + MK * D + 2 * MK + 2 * M * MK) * 4,
    )

    out = pl.pallas_call(
        functools.partial(_kan_spline_kernel, inv_tau=float(1.0 / tau), m_channels=M),
        out_shape=jax.ShapeDtypeStruct((1, B_pad), f32),
        grid_spec=pltpu.PrefetchScalarGridSpec(
            num_scalar_prefetch=0,
            grid=(grid_b,),
            in_specs=[
                pl.BlockSpec((D, block_b), lambda i: (0, i)),    # lane-dense x tile
                pl.BlockSpec((MK, D), lambda i: (0, 0)),         # W_rep^T (full)
                pl.BlockSpec((MK, 1), lambda i: (0, 0)),         # b - knots (full)
                pl.BlockSpec((MK, 1), lambda i: (0, 0)),         # b - knots[:,0] (full)
                pl.BlockSpec((2 * M, MK), lambda i: (0, 0)),     # fused den/num selector
            ],
            out_specs=pl.BlockSpec((1, block_b), lambda i: (0, i)),  # lane-dense row
        ),
        compiler_params=pltpu.CompilerParams(
            dimension_semantics=("parallel",),     # independent batch tiles
            vmem_limit_bytes=32 * 1024 * 1024,     # headroom for large tiles, all gens
        ),
        cost_estimate=cost,
    )(x_t, w_rep_t, shift_t, shift0_t, sel)
    return out[0, :B]


def _reference(x, w, b, knots, coefs, tau):
    u = x @ w + b                                        # [B, M]
    diff = u[:, :, None] - knots[None, :, :]             # [B, M, K]
    weights = jax.nn.softmax(-jnp.abs(diff) / tau, axis=-1)
    v = jnp.sum(weights * coefs[None, :, :], axis=-1)    # [B, M]
    return jnp.sum(v, axis=-1)                           # [B]


if __name__ == "__main__":
    # Small deterministic setup consistent with KanSplinePredicate(in_dim, m, K).
    IN_DIM, M_CHANNELS, N_KNOTS = 16, 8, 16
    TAU = 0.05

    key = jax.random.PRNGKey(0)
    kx1, kx2, kw, kb, kc = jax.random.split(key, 5)

    # KanProjection: nn.Linear(in_dim, m) -> weight [m, in_dim], bias [m]
    # (kept pre-transposed to [in_dim, m] for the wrapper's x @ W convention)
    bound = 1.0 / (IN_DIM ** 0.5)
    w = jax.random.uniform(kw, (IN_DIM, M_CHANNELS), jnp.float32, -bound, bound)
    b = jax.random.uniform(kb, (M_CHANNELS,), jnp.float32, -bound, bound)

    # SmoothBSplineLayer: knots = linspace(0,1,K) per channel; coefs are zeros at init,
    # so use small deterministic random values to make the output non-trivial.
    knots = jnp.tile(jnp.linspace(0.0, 1.0, N_KNOTS, dtype=jnp.float32)[None, :],
                     (M_CHANNELS, 1))
    coefs = 0.1 * jax.random.normal(kc, (M_CHANNELS, N_KNOTS), dtype=jnp.float32)

    # Case 1: tiny batch (single grid step, padded to one 128-lane tile).
    B1 = 16
    x1 = jax.random.normal(kx1, (B1, IN_DIM), dtype=jnp.float32)
    out1 = jax.block_until_ready(kan_spline_predicate(x1, w, b, knots, coefs, tau=TAU))
    ref1 = _reference(x1, w, b, knots, coefs, TAU)
    assert out1.shape == (B1,)
    assert jnp.allclose(out1, ref1, atol=1e-4, rtol=1e-4), (out1, ref1)

    # Case 2: non-multiple batch, auto-split tile -> 2-step grid (exercises padding,
    # multi-step pipelining, and the lane-dense output path).
    B2 = 300
    x2 = jax.random.normal(kx2, (B2, IN_DIM), dtype=jnp.float32)
    out2 = jax.block_until_ready(kan_spline_predicate(x2, w, b, knots, coefs, tau=TAU))
    ref2 = _reference(x2, w, b, knots, coefs, TAU)
    assert out2.shape == (B2,)
    assert jnp.allclose(out2, ref2, atol=1e-4, rtol=1e-4), (out2, ref2)

    print("KERNEL_OK")
</pallas_src>

<mosaic_0001>
module attributes {stable_mosaic.version = 11 : i64} {
  func.func @_kan_spline_kernel(%arg0: i32, %arg1: memref<16x128xf32, #tpu.memory_space<vmem>>, %arg2: memref<128x16xf32, #tpu.memory_space<vmem>>, %arg3: memref<128x1xf32, #tpu.memory_space<vmem>>, %arg4: memref<128x1xf32, #tpu.memory_space<vmem>>, %arg5: memref<16x128xf32, #tpu.memory_space<vmem>>, %arg6: memref<1x128xf32, #tpu.memory_space<vmem>>) attributes {dimension_semantics = [#tpu.dimension_semantics<parallel>], iteration_bounds = array<i64: 1>, scalar_prefetch = 0 : i64, scratch_operands = 0 : i64, tpu.core_type = #tpu.core_type<tc>, window_params = [{transform_indices = @transform_0, window_bounds = array<i64: 16, 128>}, {pipeline_mode = #tpu.pipeline_mode<synchronous>, transform_indices = @transform_1, window_bounds = array<i64: 128, 16>}, {pipeline_mode = #tpu.pipeline_mode<synchronous>, transform_indices = @transform_2, window_bounds = array<i64: 128, 1>}, {pipeline_mode = #tpu.pipeline_mode<synchronous>, transform_indices = @transform_3, window_bounds = array<i64: 128, 1>}, {pipeline_mode = #tpu.pipeline_mode<synchronous>, transform_indices = @transform_4, window_bounds = array<i64: 16, 128>}, {transform_indices = @transform_5, window_bounds = array<i64: 1, 128>}]} {
    %c0 = arith.constant 0 : index
    %c0_0 = arith.constant 0 : index
    %0 = vector.load %arg1[%c0, %c0_0] : memref<16x128xf32, #tpu.memory_space<vmem>>, vector<16x128xf32>
    %c0_1 = arith.constant 0 : index
    %c0_2 = arith.constant 0 : index
    %1 = vector.load %arg2[%c0_1, %c0_2] : memref<128x16xf32, #tpu.memory_space<vmem>>, vector<128x16xf32>
    %cst = arith.constant dense<0.000000e+00> : vector<128x128xf32>
    %2 = tpu.matmul %1, %0, %cst {dimension_numbers = #tpu.dot_dimension_numbers<[1], [0], [0], [1], [0, 0, 1, 1], [], []>} : vector<128x16xf32>, vector<16x128xf32>, vector<128x128xf32> -> vector<128x128xf32>
    %c0_3 = arith.constant 0 : index
    %c0_4 = arith.constant 0 : index
    %3 = vector.load %arg4[%c0_3, %c0_4] : memref<128x1xf32, #tpu.memory_space<vmem>>, vector<128x1xf32>
    %4 = vector.broadcast %3 : vector<128x1xf32> to vector<128x128xf32>
    %5 = arith.addf %2, %4 : vector<128x128xf32>
    %6 = math.absf %5 : vector<128x128xf32>
    %c0_5 = arith.constant 0 : index
    %c0_6 = arith.constant 0 : index
    %7 = vector.load %arg3[%c0_5, %c0_6] : memref<128x1xf32, #tpu.memory_space<vmem>>, vector<128x1xf32>
    %8 = vector.broadcast %7 : vector<128x1xf32> to vector<128x128xf32>
    %9 = arith.addf %2, %8 : vector<128x128xf32>
    %10 = math.absf %9 : vector<128x128xf32>
    %11 = arith.subf %6, %10 : vector<128x128xf32>
    %cst_7 = arith.constant 2.000000e+01 : f32
    %12 = vector.broadcast %cst_7 : f32 to vector<128x128xf32>
    %13 = arith.mulf %11, %12 : vector<128x128xf32>
    %14 = math.exp %13 : vector<128x128xf32>
    %c0_8 = arith.constant 0 : index
    %c0_9 = arith.constant 0 : index
    %15 = vector.load %arg5[%c0_8, %c0_9] : memref<16x128xf32, #tpu.memory_space<vmem>>, vector<16x128xf32>
    %cst_10 = arith.constant dense<0.000000e+00> : vector<16x128xf32>
    %16 = tpu.matmul %15, %14, %cst_10 {dimension_numbers = #tpu.dot_dimension_numbers<[1], [0], [0], [1], [0, 0, 1, 1], [], []>} : vector<16x128xf32>, vector<128x128xf32>, vector<16x128xf32> -> vector<16x128xf32>
    %17 = vector.extract_strided_slice %16 {offsets = [0, 0], sizes = [8, 128], strides = [1, 1]} : vector<16x128xf32> to vector<8x128xf32>
    %18 = vector.extract_strided_slice %16 {offsets = [8, 0], sizes = [8, 128], strides = [1, 1]} : vector<16x128xf32> to vector<8x128xf32>
    %19 = arith.divf %18, %17 : vector<8x128xf32>
    %cst_11 = arith.constant dense<0.000000e+00> : vector<128xf32>
    %20 = vector.multi_reduction <add>, %19, %cst_11 [0] : vector<8x128xf32> to vector<128xf32>
    %21 = vector.shape_cast %20 : vector<128xf32> to vector<1x128xf32>
    %c0_12 = arith.constant 0 : index
    %c0_13 = arith.constant 0 : index
    %22 = vector.load %arg6[%c0_12, %c0_13] : memref<1x128xf32, #tpu.memory_space<vmem>>, vector<1x128xf32>
    tpu.vector_store %arg6[%c0_12, %c0_13], %21 {strides = array<i32>} : memref<1x128xf32, #tpu.memory_space<vmem>>, vector<1x128xf32>,
    return
  }
  func.func @transform_0(%arg0: i32) -> (i32, i32) {
    %c0_i32 = arith.constant 0 : i32
    %c0_i32_0 = arith.constant 0 : i32
    return %c0_i32, %arg0 : i32, i32
  }
  func.func @transform_1(%arg0: i32) -> (i32, i32) {
    %c0_i32 = arith.constant 0 : i32
    %c0_i32_0 = arith.constant 0 : i32
    %c0_i32_1 = arith.constant 0 : i32
    return %c0_i32, %c0_i32_0 : i32, i32
  }
  func.func @transform_2(%arg0: i32) -> (i32, i32) {
    %c0_i32 = arith.constant 0 : i32
    %c0_i32_0 = arith.constant 0 : i32
    %c0_i32_1 = arith.constant 0 : i32
    return %c0_i32, %c0_i32_0 : i32, i32
  }
  func.func @transform_3(%arg0: i32) -> (i32, i32) {
    %c0_i32 = arith.constant 0 : i32
    %c0_i32_0 = arith.constant 0 : i32
    %c0_i32_1 = arith.constant 0 : i32
    return %c0_i32, %c0_i32_0 : i32, i32
  }
  func.func @transform_4(%arg0: i32) -> (i32, i32) {
    %c0_i32 = arith.constant 0 : i32
    %c0_i32_0 = arith.constant 0 : i32
    %c0_i32_1 = arith.constant 0 : i32
    return %c0_i32, %c0_i32_0 : i32, i32
  }
  func.func @transform_5(%arg0: i32) -> (i32, i32) {
    %c0_i32 = arith.constant 0 : i32
    %c0_i32_0 = arith.constant 0 : i32
    return %c0_i32, %arg0 : i32, i32
  }
}

</mosaic_0001>

<bundles_post_ra>
// kernel: tpu_custom_call.1
= control target key start
LH: loop header
LB: loop body
LE: loop exit
PB: predicated region body
PF: predicated region fallthrough
CT: control target
= control target key end

     0   :  { %vm39_vm0 = vcmask 130048   ;;  %v866_v3 = vmov 0   ;;  %s1115_s0 = inlined_call_operand.vmem [shape: f32[16,128], index: 0, kind: input, shape index: {}]   ;;  %s1116_s1 = inlined_call_operand.vmem [shape: f32[128,16], index: 1, kind: input, shape index: {}]   ;;  %s1117_s2 = inlined_call_operand.vmem [shape: f32[128,1], index: 2, kind: input, shape index: {}]   ;;  %s1118_s3 = inlined_call_operand.vmem [shape: f32[128,1], index: 3, kind: input, shape index: {}]   ;;  %s1119_s4 = inlined_call_operand.vmem [shape: f32[16,128], index: 4, kind: input, shape index: {}]   ;;  %s1120_s5 = inlined_call_operand.hbm [shape: f32[1,128], index: 5, kind: output, shape index: {}]  }
   0x1   :  { %v361_v0 = vld [vmem:[%s1117_s2] sm:$0xff]  ;;  %807 = vset.pattern.permute.xlu1 %v866_v3  ;;  %806 = vset.pattern.permute.xlu0 %v866_v3  ;;  %v22_v4 = vld [vmem:[%s1115_s0 + $0x8] sm:$0xff]  ;;  %v25_v10 = vld [vmem:[%s1116_s1 + $0x10] sm:$0xff] }
   0x2   :  { %v233_v1 = vld [vmem:[%s1118_s3] sm:$0xff]  ;;  %379 = vperm.xlu1 %807, %v361_v0   ;;  %v362_v7 = vld [vmem:[%s1117_s2 + $0x8] sm:$0xff]  ;;  %v236_v11 = vld [vmem:[%s1118_s3 + $0x18] sm:$0xff] }
   0x3   :  { %v21_v2 = vld [vmem:[%s1115_s0] sm:$0xff]  ;;  %251 = vperm.xlu0 %806, %v233_v1   ;;  %v234_v8 = vld [vmem:[%s1118_s3 + $0x8] sm:$0xff]  ;;  %v235_v12 = vld [vmem:[%s1118_s3 + $0x10] sm:$0xff] }
   0x4   :  { %v768_v5 = vpack.c.bf16 %v22_v4, %v21_v2  ;;  %v23_v6 = vld [vmem:[%s1116_s1] sm:$0xff]  ;;  %v24_v9 = vld [vmem:[%s1116_s1 + $0x8] sm:$0xff]  ;;  %v26_v13 = vld [vmem:[%s1116_s1 + $0x18] sm:$0xff] }
   0x5   :  { %709 = vmatprep.mubr.msk.f32.mxu0 %vm39_vm0, %v23_v6  ;;  %v27_v14 = vld [vmem:[%s1116_s1 + $0x20] sm:$0xff]  ;;  %v364_v15 = vld [vmem:[%s1117_s2 + $0x18] sm:$0xff]  ;;  %v363_v16 = vld [vmem:[%s1117_s2 + $0x10] sm:$0xff] }
   0x6   :  { %769 = vmatprep.subr.bf16.mxu0 %v768_v5  ;;  %384 = vperm.xlu1 %807, %v362_v7   ;;  %v28_v17 = vld [vmem:[%s1116_s1 + $0x28] sm:$0xff]  ;;  %v29_v18 = vld [vmem:[%s1116_s1 + $0x30] sm:$0xff]  ;;  %v237_v20 = vld [vmem:[%s1118_s3 + $0x20] sm:$0xff] }
   0x7   :  { %771 = vmatpush3.bf16.msra.mxu0 %v768_v5  ;;  %256 = vperm.xlu0 %806, %v234_v8   ;;  %v238_v19 = vld [vmem:[%s1118_s3 + $0x28] sm:$0xff] }
   0xa   :  { %710 = vmatmul.mubr.msk.f32.vlgmr.msra.gmra.mrb[0].mxu0 %vm39_vm0, %v24_v9  ;;  %266 = vperm.xlu1 %807, %v236_v11  }
   0xb   :  { %712 = vmatprep.mubr.msk.f32.mxu0 %vm39_vm0, %v25_v10  ;;  %261 = vperm.xlu0 %806, %v235_v12  }
   0xe   :  { %713 = vmatmul.mubr.msk.f32.gmra.mrb[2].mxu0 %vm39_vm0, %v26_v13  ;;  %394 = vperm.xlu1 %807, %v364_v15  }
   0xf   :  { %715 = vmatprep.mubr.msk.f32.mxu0 %vm39_vm0, %v27_v14  ;;  %389 = vperm.xlu0 %806, %v363_v16  }
  0x12   :  { %716 = vmatmul.mubr.msk.f32.gmra.mrb[4].mxu0 %vm39_vm0, %v28_v17 }
  0x13   :  { %10 = vsyncpa [#allocation3], 0  ;;  %718 = vmatprep.mubr.msk.f32.mxu0 %vm39_vm0, %v29_v18  ;;  %v30_v21 = vld [vmem:[%s1116_s1 + $0x38] sm:$0xff]  ;;  %276 = vperm.xlu1 %807, %v238_v19   ;;  %v31_v22 = vld [vmem:[%s1116_s1 + $0x40] sm:$0xff]  ;;  %s867_s15 = smov [#allocation2]  }
  0x14   :  { %271 = vperm.xlu0 %806, %v237_v20   ;;  %v366_v23 = vld [vmem:[%s1117_s2 + $0x28] sm:$0xff]  ;;  %v365_v24 = vld [vmem:[%s1117_s2 + $0x20] sm:$0xff]  ;;  %v33_v26 = vld [vmem:[%s1116_s1 + $0x50] sm:$0xff]  ;;  %s645_s16 = sshll.u32 %s867_s15, 4  ;;  %s646_s16 = int_to_ptr.vmem [resolvable:$true] %s645_s16 }
  0x15   :  { %v32_v25 = vld [vmem:[%s1116_s1 + $0x48] sm:$0xff]  ;;  %v240_v27 = vld [vmem:[%s1118_s3 + $0x38] sm:$0xff]  ;;  %v239_v28 = vld [vmem:[%s1118_s3 + $0x30] sm:$0xff]  ;;  %s842_s17 = scalar_lea.vmem %s646_s16, 16  ;;  %s846_s18 = scalar_lea.vmem %s646_s16, 32 }
  0x16   :  { %719 = vmatmul.mubr.msk.f32.gmra.mrb[6].mxu0 %vm39_vm0, %v30_v21  ;;  %v34_v29 = vld [vmem:[%s1116_s1 + $0x58] sm:$0xff]  ;;  %v35_v30 = vld [vmem:[%s1116_s1 + $0x60] sm:$0xff]  ;;  %v367_v32 = vld [vmem:[%s1117_s2 + $0x30] sm:$0xff]  ;;  %p843_p0 = scmp.ne.s32.totalorder %s646_s16, %s842_s17  ;;  %p847_p1 = scmp.lt.s32.totalorder %s646_s16, %s646_s16 }
  0x17   :  { %721 = vmatprep.mubr.msk.f32.mxu0 %vm39_vm0, %v31_v22  ;;  %404 = vperm.xlu1 %807, %v366_v23   ;;  %v368_v31 = vld [vmem:[%s1117_s2 + $0x38] sm:$0xff]  ;;  %v36_v33 = vld [vmem:[%s1116_s1 + $0x68] sm:$0xff]  ;;  %v37_v34 = vld [vmem:[%s1116_s1 + $0x70] sm:$0xff]  ;;  %p848_p2 = scmp.lt.s32.totalorder %s846_s18, %s842_s17 }
  0x18   :  { %399 = vperm.xlu0 %806, %v365_v24   ;;  %v242_v35 = vld [vmem:[%s1118_s3 + $0x48] sm:$0xff]  ;;  %v241_v36 = vld [vmem:[%s1118_s3 + $0x40] sm:$0xff]  ;;  %v38_v37 = vld [vmem:[%s1116_s1 + $0x78] sm:$0xff] }
  0x19   :  { %v370_v38 = vld [vmem:[%s1117_s2 + $0x48] sm:$0xff]  ;;  %v369_v39 = vld [vmem:[%s1117_s2 + $0x40] sm:$0xff]  ;;  %v244_v40 = vld [vmem:[%s1118_s3 + $0x58] sm:$0xff]  ;;  %p849_p3 = por %p848_p2, %p847_p1 }
  0x1a   :  { %722 = vmatmul.mubr.msk.f32.gmra.mrb[8].mxu0 %vm39_vm0, %v32_v25  ;;  %v243_v41 = vld [vmem:[%s1118_s3 + $0x50] sm:$0xff]  ;;  %v372_v42 = vld [vmem:[%s1117_s2 + $0x58] sm:$0xff]  ;;  %v246_v44 = vld [vmem:[%s1118_s3 + $0x68] sm:$0xff] }
  0x1b   :  { %724 = vmatprep.mubr.msk.f32.mxu0 %vm39_vm0, %v33_v26  ;;  %286 = vperm.xlu1 %807, %v240_v27   ;;  %v371_v43 = vld [vmem:[%s1117_s2 + $0x50] sm:$0xff]  ;;  %v245_v45 = vld [vmem:[%s1118_s3 + $0x60] sm:$0xff]  ;;  %v374_v46 = vld [vmem:[%s1117_s2 + $0x68] sm:$0xff]  ;;  %p850_p4 = pnand %p849_p3, %p843_p0 }
  0x1c   :  { %281 = vperm.xlu0 %806, %v239_v28   ;;  %v373_v47 = vld [vmem:[%s1117_s2 + $0x60] sm:$0xff]  ;;  %v248_v48 = vld [vmem:[%s1118_s3 + $0x78] sm:$0xff]  ;;  %v247_v49 = vld [vmem:[%s1118_s3 + $0x70] sm:$0xff] }
  0x1d   :  { %v376_v50 = vld [vmem:[%s1117_s2 + $0x78] sm:$0xff]  ;;  %v375_v51 = vld [vmem:[%s1117_s2 + $0x70] sm:$0xff]  ;;  %v553_v52 = vld [vmem:[%s1119_s4] sm:$0xff] }
  0x1e   :  { %725 = vmatmul.mubr.msk.f32.gmra.mrb[10].mxu0 %vm39_vm0, %v34_v29  ;;  %765 = vmatprep.mubr.f32.mxu1 %v553_v52 }
  0x1f   :  { %727 = vmatprep.mubr.msk.f32.mxu0 %vm39_vm0, %v35_v30  ;;  %414 = vperm.xlu1 %807, %v368_v31  }
  0x20   :  { %409 = vperm.xlu0 %806, %v367_v32  }
  0x22   :  { %728 = vmatmul.mubr.msk.f32.gmra.mrb[12].mxu0 %vm39_vm0, %v36_v33 }
  0x23   :  { %730 = vmatprep.mubr.msk.f32.mxu0 %vm39_vm0, %v37_v34  ;;  %296 = vperm.xlu1 %807, %v242_v35  }
  0x24   :  { %291 = vperm.xlu0 %806, %v241_v36  }
  0x26   :  { %731 = vmatmul.mubr.msk.f32.gmra.mrb[14].mxu0 %vm39_vm0, %v38_v37 }
  0x27   :  { %424 = vperm.xlu1 %807, %v370_v38  }
  0x28   :  { %419 = vperm.xlu0 %806, %v369_v39  }
  0x2b   :  { %306 = vperm.xlu1 %807, %v244_v40  }
  0x2c   :  { %301 = vperm.xlu0 %806, %v243_v41  }
  0x2f   :  { %434 = vperm.xlu1 %807, %v372_v42  }
  0x30   :  { %429 = vperm.xlu0 %806, %v371_v43  }
  0x33   :  { %316 = vperm.xlu1 %807, %v246_v44  }
  0x34   :  { %311 = vperm.xlu0 %806, %v245_v45  }
  0x37   :  { %444 = vperm.xlu1 %807, %v374_v46  }
  0x38   :  { %439 = vperm.xlu0 %806, %v373_v47  }
  0x3b   :  { %326 = vperm.xlu1 %807, %v248_v48  }
  0x3c   :  { %321 = vperm.xlu0 %806, %v247_v49  }
  0x3f   :  { %454 = vperm.xlu1 %807, %v376_v50  }
  0x40   :  { %449 = vperm.xlu0 %806, %v375_v51  }
  0x81   :  { %v380_v53 = vpop.permute.xlu1 %379 }
  0x82   :  { %v252_v54 = vpop.permute.xlu0 %251 }
  0x85   :  { %v385_v55 = vpop.permute.xlu1 %384 }
  0x86   :  { %v257_v56 = vpop.permute.xlu0 %256 }
  0x89   :  { %v267_v57 = vpop.permute.xlu1 %266 }
  0x8a   :  { %v262_v58 = vpop.permute.xlu0 %261 }
  0x8d   :  { %v395_v59 = vpop.permute.xlu1 %394 }
  0x8e   :  { %v390_v60 = vpop.permute.xlu0 %389 }
  0x92   :  { %v277_v61 = vpop.permute.xlu1 %276 }
  0x93   :  { %v272_v62 = vpop.permute.xlu0 %271 }
  0x96   :  { %v405_v63 = vpop.permute.xlu1 %404 }
  0x97   :  { %v400_v0 = vpop.permute.xlu0 %399 }
  0x9a   :  { %v287_v1 = vpop.permute.xlu1 %286 }
  0x9b   :  { %v1067_v2 = vpop.permute.xlu0 %281 }
  0x9e   :  { %v415_v3 = vpop.permute.xlu1 %414 }
  0x9f   :  { %v410_v4 = vpop.permute.xlu0 %409 }
  0xa2   :  { %v1069_v5 = vpop.permute.xlu1 %296 }
  0xa3   :  { %v1071_v6 = vpop.permute.xlu0 %291 }
  0xa6   :  { %v1073_v7 = vpop.permute.xlu1 %424 }
  0xa7   :  { %v1075_v8 = vpop.permute.xlu0 %419 }
  0xaa   :  { %v1077_v9 = vpop.permute.xlu1 %306 }
  0xab   :  { %v1079_v10 = vpop.permute.xlu0 %301 }
  0xae   :  { %v1081_v22 = vpop.permute.xlu1 %434 }
  0xaf   :  { %v1083_v27 = vpop.permute.xlu0 %429 }
  0xb2   :  { %v1085_v47 = vpop.permute.xlu1 %316 }
  0xb3   :  { %v1087_v51 = vpop.permute.xlu0 %311 }
  0xdd   :  { %v711_v11 = vpop.f32.mrb[0].mxu0 }
  0xde   :  { %v330_v12 = vadd.f32 %v711_v11, %v257_v56  ;;  %v458_v13 = vadd.f32 %v711_v11, %v385_v55  ;;  %v154_v14 = vpop.f32.mrb[1].mxu0 }
  0xdf   :  { %v329_v15 = vadd.f32 %v252_v54, %v154_v14  ;;  %v457_v16 = vadd.f32 %v380_v53, %v154_v14 }
  0xe0   :  { %v346_v17 = vand.u32 2147483647, %v330_v12  ;;  %v474_v18 = vand.u32 2147483647, %v458_v13 }
  0xe1   :  { %v345_v19 = vand.u32 2147483647, %v329_v15  ;;  %v473_v20 = vand.u32 2147483647, %v457_v16  ;;  %v714_v21 = vpop.f32.mrb[2].mxu0 }
  0xe2   :  { %v490_v23 = vsub.f32 %v346_v17, %v474_v18  ;;  %v332_v24 = vadd.f32 %v714_v21, %v267_v57  ;;  %v460_v25 = vadd.f32 %v714_v21, %v395_v59  ;;  %v164_v26 = vpop.f32.mrb[3].mxu0  ;;  %v445_v18 = vpop.permute.xlu1 %444 }
  0xe3   :  { %v489_v28 = vsub.f32 %v345_v19, %v473_v20  ;;  %v331_v29 = vadd.f32 %v262_v58, %v164_v26  ;;  %v459_v30 = vadd.f32 %v390_v60, %v164_v26 }
  0xe4   :  { %v506_v31 = vmul.f32 20.0, %v490_v23  ;;  %v348_v32 = vand.u32 2147483647, %v332_v24  ;;  %v476_v33 = vand.u32 2147483647, %v460_v25  ;;  %v440_v23 = vpop.permute.xlu0 %439 }
  0xe5   :  { %v505_v34 = vmul.f32 20.0, %v489_v28  ;;  %v347_v35 = vand.u32 2147483647, %v331_v29  ;;  %v475_v36 = vand.u32 2147483647, %v459_v30  ;;  %v717_v37 = vpop.f32.mrb[4].mxu0 }
  0xe6   :  { %v523_v38 = vmul.f32 1.442695, %v506_v31  ;;  %v492_v39 = vsub.f32 %v348_v32, %v476_v33  ;;  %v334_v40 = vadd.f32 %v717_v37, %v277_v61  ;;  %v462_v41 = vadd.f32 %v717_v37, %v405_v63  ;;  %v174_v42 = vpop.f32.mrb[5].mxu0 }
  0xe7   :  { %v521_v43 = vmul.f32 1.442695, %v505_v34  ;;  %v491_v44 = vsub.f32 %v347_v35, %v475_v36  ;;  %v333_v45 = vadd.f32 %v272_v62, %v174_v42  ;;  %v461_v46 = vadd.f32 %v400_v0, %v174_v42 }
  0xe8   :  { %808 = vpow2.f32 %v523_v38  ;;  %v508_v48 = vmul.f32 20.0, %v492_v39  ;;  %v350_v49 = vand.u32 2147483647, %v334_v40  ;;  %v478_v50 = vand.u32 2147483647, %v462_v41  ;;  %v327_v41 = vpop.permute.xlu1 %326 }
  0xe9   :  { %810 = vpow2.f32 %v521_v43  ;;  %v507_v52 = vmul.f32 20.0, %v491_v44  ;;  %v349_v53 = vand.u32 2147483647, %v333_v45  ;;  %v477_v54 = vand.u32 2147483647, %v461_v46  ;;  %v720_v55 = vpop.f32.mrb[6].mxu0  ;;  %v322_v45 = vpop.permute.xlu0 %321 }
  0xea   :  { %v527_v56 = vmul.f32 1.442695, %v508_v48  ;;  %v494_v57 = vsub.f32 %v350_v49, %v478_v50  ;;  %v336_v58 = vadd.f32 %v720_v55, %v287_v1  ;;  %v464_v59 = vadd.f32 %v720_v55, %v415_v3  ;;  %v184_v60 = vpop.f32.mrb[7].mxu0 }
  0xeb   :  { %v525_v61 = vmul.f32 1.442695, %v507_v52  ;;  %v493_v62 = vsub.f32 %v349_v53, %v477_v54  ;;  %v335_v63 = vadd.f32 %v1067_v2, %v184_v60  ;;  %v463_v0 = vadd.f32 %v410_v4, %v184_v60 }
  0xec   :  { %812 = vpow2.f32 %v527_v56  ;;  %v510_v11 = vmul.f32 20.0, %v494_v57  ;;  %v352_v12 = vand.u32 2147483647, %v336_v58  ;;  %v480_v13 = vand.u32 2147483647, %v464_v59 }
  0xed   :  { %814 = vpow2.f32 %v525_v61  ;;  %v509_v14 = vmul.f32 20.0, %v493_v62  ;;  %v351_v15 = vand.u32 2147483647, %v335_v63  ;;  %v479_v16 = vand.u32 2147483647, %v463_v0  ;;  %v723_v17 = vpop.f32.mrb[8].mxu0 }
  0xee   :  { %v531_v19 = vmul.f32 1.442695, %v510_v11  ;;  %v496_v20 = vsub.f32 %v352_v12, %v480_v13  ;;  %v338_v1 = vadd.f32 %v723_v17, %v1069_v5  ;;  %v466_v3 = vadd.f32 %v723_v17, %v1073_v7  ;;  %v194_v21 = vpop.f32.mrb[9].mxu0  ;;  %v455_v13 = vpop.permute.xlu1 %454 }
  0xef   :  { %v529_v2 = vmul.f32 1.442695, %v509_v14  ;;  %v495_v4 = vsub.f32 %v351_v15, %v479_v16  ;;  %v337_v24 = vadd.f32 %v1071_v6, %v194_v21  ;;  %v465_v25 = vadd.f32 %v1075_v8, %v194_v21 }
  0xf0   :  { %816 = vpow2.f32 %v531_v19  ;;  %v512_v26 = vmul.f32 20.0, %v496_v20  ;;  %v354_v28 = vand.u32 2147483647, %v338_v1  ;;  %v482_v29 = vand.u32 2147483647, %v466_v3  ;;  %v450_v19 = vpop.permute.xlu0 %449 }
  0xf1   :  { %818 = vpow2.f32 %v529_v2  ;;  %v511_v30 = vmul.f32 20.0, %v495_v4  ;;  %v353_v31 = vand.u32 2147483647, %v337_v24  ;;  %v481_v32 = vand.u32 2147483647, %v465_v25  ;;  %v726_v33 = vpop.f32.mrb[10].mxu0 }
  0xf2   :  { %v809_v5 = vpop.eup %808  ;;  %v535_v34 = vmul.f32 1.442695, %v512_v26  ;;  %v498_v7 = vsub.f32 %v354_v28, %v482_v29  ;;  %v340_v35 = vadd.f32 %v726_v33, %v1077_v9  ;;  %v468_v36 = vadd.f32 %v726_v33, %v1081_v22  ;;  %v204_v37 = vpop.f32.mrb[11].mxu0 }
  0xf3   :  { %v811_v6 = vpop.eup %810  ;;  %v533_v38 = vmul.f32 1.442695, %v511_v30  ;;  %v497_v8 = vsub.f32 %v353_v31, %v481_v32  ;;  %v339_v39 = vadd.f32 %v1079_v10, %v204_v37  ;;  %v467_v40 = vadd.f32 %v1083_v27, %v204_v37 }
  0xf4   :  { %820 = vpow2.f32 %v535_v34  ;;  %v514_v42 = vmul.f32 20.0, %v498_v7  ;;  %v356_v43 = vand.u32 2147483647, %v340_v35  ;;  %v484_v44 = vand.u32 2147483647, %v468_v36 }
  0xf5   :  { %822 = vpow2.f32 %v533_v38  ;;  %v513_v46 = vmul.f32 20.0, %v497_v8  ;;  %v355_v48 = vand.u32 2147483647, %v339_v39  ;;  %v483_v9 = vand.u32 2147483647, %v467_v40  ;;  %v729_v49 = vpop.f32.mrb[12].mxu0 }
  0xf6   :  { %v813_v22 = vpop.eup %812  ;;  %v539_v50 = vmul.f32 1.442695, %v514_v42  ;;  %v500_v52 = vsub.f32 %v356_v43, %v484_v44  ;;  %v342_v53 = vadd.f32 %v729_v49, %v1085_v47  ;;  %v470_v54 = vadd.f32 %v729_v49, %v445_v18  ;;  %v214_v10 = vpop.f32.mrb[13].mxu0  ;;  %v554_v49 = vld [vmem:[%s1119_s4 + $0x8] sm:$0xff] }
  0xf7   :  { %v815_v55 = vpop.eup %814  ;;  %v537_v27 = vmul.f32 1.442695, %v513_v46  ;;  %v499_v56 = vsub.f32 %v355_v48, %v483_v9  ;;  %v341_v57 = vadd.f32 %v1087_v51, %v214_v10  ;;  %v469_v58 = vadd.f32 %v440_v23, %v214_v10 }
  0xf8   :  { %824 = vpow2.f32 %v539_v50  ;;  %v516_v59 = vmul.f32 20.0, %v500_v52  ;;  %v358_v60 = vand.u32 2147483647, %v342_v53  ;;  %v486_v61 = vand.u32 2147483647, %v470_v54 }
  0xf9   :  { %826 = vpow2.f32 %v537_v27  ;;  %v515_v62 = vmul.f32 20.0, %v499_v56  ;;  %v357_v63 = vand.u32 2147483647, %v341_v57  ;;  %v485_v0 = vand.u32 2147483647, %v469_v58  ;;  %v732_v11 = vpop.f32.mrb[14].mxu0 }
  0xfa   :  { %v817_v12 = vpop.eup %816  ;;  %v543_v47 = vmul.f32 1.442695, %v516_v59  ;;  %v502_v14 = vsub.f32 %v358_v60, %v486_v61  ;;  %v772_v15 = vpack.c.bf16 %v809_v5, %v811_v6  ;;  %v344_v16 = vadd.f32 %v732_v11, %v327_v41  ;;  %v224_v17 = vpop.f32.mrb[15].mxu0 }
  0xfb   :  { %v819_v18 = vpop.eup %818  ;;  %v541_v51 = vmul.f32 1.442695, %v515_v62  ;;  %v501_v20 = vsub.f32 %v357_v63, %v485_v0  ;;  %v472_v1 = vadd.f32 %v732_v11, %v455_v13  ;;  %v343_v3 = vadd.f32 %v322_v45, %v224_v17 }
  0xfc   :  { %828 = vpow2.f32 %v543_v47  ;;  %v518_v21 = vmul.f32 20.0, %v502_v14  ;;  %773 = vmatprep.subr.bf16.mxu1 %v772_v15  ;;  %v360_v23 = vand.u32 2147483647, %v344_v16  ;;  %v471_v2 = vadd.f32 %v450_v19, %v224_v17 }
  0xfd   :  { %830 = vpow2.f32 %v541_v51  ;;  %v517_v4 = vmul.f32 20.0, %v501_v20  ;;  %775 = vmatpush3.bf16.msra.mxu1 %v772_v15  ;;  %v488_v24 = vand.u32 2147483647, %v472_v1  ;;  %v359_v25 = vand.u32 2147483647, %v343_v3 }
  0xfe   :  { %v821_v26 = vpop.eup %820  ;;  %v547_v28 = vmul.f32 1.442695, %v518_v21  ;;  %v487_v29 = vand.u32 2147483647, %v471_v2  ;;  %v776_v30 = vpack.c.bf16 %v813_v22, %v815_v55  ;;  %v780_v31 = vpack.c.bf16 %v817_v12, %v819_v18 }
  0xff   :  { %v823_v32 = vpop.eup %822  ;;  %v545_v33 = vmul.f32 1.442695, %v517_v4  ;;  %v504_v5 = vsub.f32 %v360_v23, %v488_v24 }
 0x100   :  { %832 = vpow2.f32 %v547_v28  ;;  %v503_v34 = vsub.f32 %v359_v25, %v487_v29  ;;  %777 = vmatprep.subr.bf16.mxu1 %v776_v30  ;;  %v784_v7 = vpack.c.bf16 %v821_v26, %v823_v32 }
 0x101   :  { %834 = vpow2.f32 %v545_v33  ;;  %v520_v35 = vmul.f32 20.0, %v504_v5  ;;  %779 = vmatpush3.bf16.msra.mxu1 %v776_v30 }
 0x102   :  { %v825_v36 = vpop.eup %824  ;;  %v519_v37 = vmul.f32 20.0, %v503_v34  ;;  %781 = vmatprep.subr.bf16.mxu1 %v780_v31 }
 0x103   :  { %v827_v6 = vpop.eup %826  ;;  %v551_v38 = vmul.f32 1.442695, %v520_v35 }
 0x104   :  { %v549_v8 = vmul.f32 1.442695, %v519_v37  ;;  %v788_v39 = vpack.c.bf16 %v825_v36, %v827_v6 }
 0x105   :  { %836 = vpow2.f32 %v551_v38  ;;  %783 = vmatpush3.bf16.msra.mxu1 %v780_v31 }
 0x106   :  { %v829_v40 = vpop.eup %828  ;;  %838 = vpow2.f32 %v549_v8  ;;  %785 = vmatprep.subr.bf16.mxu1 %v784_v7 }
 0x107   :  { %v831_v41 = vpop.eup %830 }
 0x108   :  { %v792_v42 = vpack.c.bf16 %v829_v40, %v831_v41 }
 0x109   :  { %787 = vmatpush3.bf16.msra.mxu1 %v784_v7 }
 0x10a   :  { %v833_v43 = vpop.eup %832  ;;  %789 = vmatprep.subr.bf16.mxu1 %v788_v39 }
 0x10b   :  { %v835_v44 = vpop.eup %834 }
 0x10c   :  { %v796_v45 = vpack.c.bf16 %v833_v43, %v835_v44 }
 0x10d   :  { %791 = vmatpush3.bf16.msra.mxu1 %v788_v39 }
 0x10e   :  { %793 = vmatprep.subr.bf16.mxu1 %v792_v42 }
 0x10f   :  { %v837_v46 = vpop.eup %836 }
 0x110   :  { %v839_v48 = vpop.eup %838 }
 0x111   :  { %795 = vmatpush3.bf16.msra.mxu1 %v792_v42  ;;  %v800_v9 = vpack.c.bf16 %v837_v46, %v839_v48 }
 0x112   :  { %797 = vmatprep.subr.bf16.mxu1 %v796_v45 }
 0x115   :  { %799 = vmatpush3.bf16.msra.mxu1 %v796_v45 }
 0x116   :  { %801 = vmatprep.subr.bf16.mxu1 %v800_v9 }
 0x119   :  { %803 = vmatpush3.bf16.msra.mxu1 %v800_v9 }
 0x11c   :  { %766 = vmatmul.mubr.f32.vlgmr.msra.gmra.mrb[0].mxu1 %v554_v49 }
 0x1ef   :  { %v767_v22 = vpop.f32.mrb[0].mxu1 }
 0x1f0   :  { %v621_v50 = vpop.f32.mrb[1].mxu1 }
 0x1f1   :  { %840 = vrcp.f32 %v621_v50 }
 0x1fb   :  { %v841_v52 = vpop.eup %840 }
 0x1fc   :  { %v631_v53 = vmul.f32 %v841_v52, %v767_v22 }
 0x1fe   :  { %v632_v54 = vrot.slane %v631_v53, 4 }
 0x200   :  { %v633_v10 = vadd.f32 %v632_v54, %v631_v53 }
 0x202   :  { %v634_v55 = vrot.slane %v633_v10, 2 }
 0x204   :  { %v635_v27 = vadd.f32 %v634_v55, %v633_v10 }
 0x206   :  { %v636_v56 = vrot.slane %v635_v27, 1 }
 0x208   :  { %v637_v57 = vadd.f32 %v636_v56, %v635_v27 }
 0x20a   :  { %638 = vst [vmem:[#allocation2] sm:$0x1] %v637_v57 }
 0x20b   :  { %853 = shalt.err (!%p850_p4)
}
 0x20c   :  { %s854_s19 = scalar_lea.hbm %s1120_s5, 16 }
 0x20d   :  { %p855_p5 = scmp.ne.s32.totalorder %s1120_s5, %s854_s19  ;;  %p858_p6 = scmp.lt.u32.totalorder %s854_s19, %s1120_s5 }
 0x20f   :  { %p860_p7 = pnand %p858_p6, %p855_p5 }
 0x211   :  { %863 = shalt.err (!%p860_p7)
}
 0x212   :  { %648 = dma.vmem_to_hbm [thread:$0]  %s646_s16, 16, %s1120_s5, [#allocation3]  }
 0x213   :  { %864 = dma.done.wait [#allocation3], 16  }
 0x214   :  { %865 = vsyncadd [#allocation3], 4294967280 }
 0x215   :  { %652 = vsyncpa [#allocation3], 1 }

</bundles_post_ra>
